<compile_context>
chip_gen: v6e
topology: v6e:2x2x1
jax: 0.10.0
libtpu: 0.0.40
codegen_flags: <defaults>
</compile_context>

<pallas_src>
import functools

import jax
import jax.numpy as jnp
from jax.experimental import pallas as pl
from jax.experimental.pallas import tpu as pltpu

# `epsilon` is a module-level global in the reference code; use a standard small value.
EPSILON = 1e-8

_LANE = 128
_TILE_TARGET_BYTES = 2 * 1024 * 1024      # per I/O block, in the input's dtype
_VMEM_LIMIT_FLOOR = 32 * 1024 * 1024      # covers v5e's 16 MiB scoped default
_VMEM_LIMIT_CAP = 60 * 1024 * 1024        # stay under v7x's 64 MiB physical VMEM


def _l2logprob_kernel(x_ref, o_ref, *, c_eps):
    # Tile: (C, tile_s, 128) or (C, tile_hw).  Channels sit on the leading axis so
    # the reduction is a plain VPU add over axis 0 (no cross-lane work per element).
    x = x_ref[...].astype(jnp.float32)
    # Epsilon folded into the reduction: one add per spatial column, not per element.
    denom = jnp.sum(x, axis=0, keepdims=True) + c_eps
    # Approx EUP reciprocal + one Newton-Raphson step (rel. err ~1e-8): fewer VALU
    # ops than an exact divide, and only 1/C of the per-element volume.
    inv = pl.reciprocal(denom, approx=True)
    inv = inv * (2.0 - denom * inv)
    y = jnp.maximum(x * inv, EPSILON)          # clamp(epsilon, None)
    o_ref[...] = jnp.log(y).astype(o_ref.dtype)


def l2logprob(x_nchw: jax.Array) -> jax.Array:
    """x_nchw: [B, C, H, W] -> log-normalized [B, C, H, W] (PyTorch L2LogProb.forward)."""
    B, C, H, W = x_nchw.shape
    HW = H * W
    itemsize = jnp.dtype(x_nchw.dtype).itemsize

    if HW % _LANE == 0:
        # Lane-dense layout (B, C, S, 128): metadata-only reshape, no extra HBM pass.
        S = HW // _LANE
        max_tile_s = max(1, _TILE_TARGET_BYTES // (C * _LANE * itemsize))
        if S <= max_tile_s:
            tile_s, num_s = S, 1                       # block == full dim (no 8-div needed)
        else:
            tile_s = max(8, (max_tile_s // 8) * 8)     # sublane-aligned tile
            num_s = pl.cdiv(S, tile_s)
        # v7x has 2 TensorCores: guarantee >= 2 parallel grid steps when possible.
        if B * num_s < 2 and S >= 16:
            tile_s = max(8, ((pl.cdiv(S, 2) + 7) // 8) * 8)
            num_s = pl.cdiv(S, tile_s)
        x = x_nchw.reshape(B, C, S, _LANE)
        block = (pl.Squeezed(), C, tile_s, _LANE)
        index_map = lambda b, s: (b, 0, s, 0)
        block_cols = tile_s * _LANE
    else:
        # Fallback: keep (B, C, HW) — the partial boundary block along HW is masked by
        # Pallas, so no pad / post-slice HBM round-trips are ever needed.
        max_tile_hw = max(_LANE, (_TILE_TARGET_BYTES // (C * _LANE * itemsize)) * _LANE)
        if HW <= max_tile_hw:
            tile_hw, num_s = HW, 1                     # block == full dim
        else:
            tile_hw = max_tile_hw                      # multiple of 128
            num_s = pl.cdiv(HW, tile_hw)
        if B * num_s < 2 and HW >= 2 * _LANE:
            tile_hw = max(_LANE, pl.cdiv(pl.cdiv(HW, 2), _LANE) * _LANE)
            num_s = pl.cdiv(HW, tile_hw)
        x = x_nchw.reshape(B, C, HW)
        block = (pl.Squeezed(), C, tile_hw)
        index_map = lambda b, s: (b, 0, s)
        block_cols = tile_hw

    # Explicit VMEM budget: 2 in + 2 out pipeline buffers (I/O dtype) + f32 temporaries.
    io_block_bytes = C * block_cols * itemsize
    f32_block_bytes = C * block_cols * 4
    est_working_set = 4 * io_block_bytes + 3 * f32_block_bytes + (1 << 20)
    # TODO(synk): for very large C (~>=4096 in f32) even the minimum block exceeds the
    # v7x 64 MiB VMEM budget; that regime would need a two-pass (denominator, normalize) kernel.
    vmem_limit = int(min(_VMEM_LIMIT_CAP, max(_VMEM_LIMIT_FLOOR, est_working_set)))

    total = B * C * HW
    cost = pl.CostEstimate(
        flops=3 * total + 2 * B * HW,                  # mul, clamp, reduce-adds, Newton step
        transcendentals=total + B * HW,                # log per element + rcp per spatial column
        bytes_accessed=2 * total * itemsize,           # 1 read + 1 write per element
    )

    kernel = functools.partial(_l2logprob_kernel, c_eps=float(C) * EPSILON)

    out = pl.pallas_call(
        kernel,
        out_shape=jax.ShapeDtypeStruct(x.shape, x_nchw.dtype),
        grid_spec=pltpu.PrefetchScalarGridSpec(
            num_scalar_prefetch=0,
            grid=(B, num_s),
            in_specs=[pl.BlockSpec(block, index_map)],
            out_specs=pl.BlockSpec(block, index_map),
        ),
        compiler_params=pltpu.CompilerParams(
            dimension_semantics=("parallel", "parallel"),
            vmem_limit_bytes=vmem_limit,
        ),
        cost_estimate=cost,
    )(x)

    return out.reshape(B, C, H, W)


def _reference(x_nchw: jax.Array) -> jax.Array:
    denom = jnp.sum(x_nchw + EPSILON, axis=1, keepdims=True)
    y = x_nchw / denom
    y = jnp.maximum(y, EPSILON)
    return jnp.log(y)


if __name__ == "__main__":
    # Main test: lane-aligned spatial dim (HW % 128 == 0), batch-parallel grid.
    key = jax.random.PRNGKey(0)
    B, C, H, W = 2, 4, 16, 16
    # Non-negative inputs (probability-like mass), matching how this layer is used.
    x = jax.random.uniform(key, (B, C, H, W), dtype=jnp.float32, minval=0.0, maxval=1.0)

    y = jax.block_until_ready(l2logprob(x))
    y_ref = _reference(x)
    assert y.shape == (B, C, H, W)
    assert jnp.allclose(y, y_ref, atol=1e-5, rtol=1e-5), "mismatch vs reference (aligned path)"

    # Fallback test: HW not a multiple of 128 (no pad, no post-slice).
    key2 = jax.random.PRNGKey(0)
    B2, C2, H2, W2 = 1, 4, 12, 12
    x2 = jax.random.uniform(key2, (B2, C2, H2, W2), dtype=jnp.float32, minval=0.0, maxval=1.0)
    y2 = jax.block_until_ready(l2logprob(x2))
    y2_ref = _reference(x2)
    assert y2.shape == (B2, C2, H2, W2)
    assert jnp.allclose(y2, y2_ref, atol=1e-5, rtol=1e-5), "mismatch vs reference (fallback path)"

    print("KERNEL_OK")
</pallas_src>

<mosaic_0001>
module attributes {stable_mosaic.version = 11 : i64} {
  func.func @_l2logprob_kernel(%arg0: i32, %arg1: i32, %arg2: memref<1x4x2x128xf32, #tpu.memory_space<vmem>>, %arg3: memref<1x4x2x128xf32, #tpu.memory_space<vmem>>) attributes {dimension_semantics = [#tpu.dimension_semantics<parallel>, #tpu.dimension_semantics<parallel>], iteration_bounds = array<i64: 2, 1>, scalar_prefetch = 0 : i64, scratch_operands = 0 : i64, tpu.core_type = #tpu.core_type<tc>, window_params = [{transform_indices = @transform_0, window_bounds = array<i64: 1, 4, 2, 128>}, {transform_indices = @transform_1, window_bounds = array<i64: 1, 4, 2, 128>}]} {
    %c0 = arith.constant 0 : index
    %c0_0 = arith.constant 0 : index
    %c0_1 = arith.constant 0 : index
    %c0_2 = arith.constant 0 : index
    %0 = vector.load %arg2[%c0, %c0_0, %c0_1, %c0_2] : memref<1x4x2x128xf32, #tpu.memory_space<vmem>>, vector<1x4x2x128xf32>
    %1 = vector.shape_cast %0 : vector<1x4x2x128xf32> to vector<4x2x128xf32>
    %cst = arith.constant dense<0.000000e+00> : vector<2x128xf32>
    %2 = vector.multi_reduction <add>, %1, %cst [0] : vector<4x2x128xf32> to vector<2x128xf32>
    %3 = vector.shape_cast %2 : vector<2x128xf32> to vector<1x2x128xf32>
    %cst_3 = arith.constant 4.000000e-08 : f32
    %4 = vector.broadcast %cst_3 : f32 to vector<1x2x128xf32>
    %5 = arith.addf %3, %4 : vector<1x2x128xf32>
    %6 = tpu.reciprocal %5 {approx = true} : vector<1x2x128xf32> -> vector<1x2x128xf32>
    %7 = arith.mulf %5, %6 : vector<1x2x128xf32>
    %cst_4 = arith.constant 2.000000e+00 : f32
    %8 = vector.broadcast %cst_4 : f32 to vector<1x2x128xf32>
    %9 = arith.subf %8, %7 : vector<1x2x128xf32>
    %10 = arith.mulf %6, %9 : vector<1x2x128xf32>
    %11 = vector.broadcast %10 : vector<1x2x128xf32> to vector<4x2x128xf32>
    %12 = arith.mulf %1, %11 : vector<4x2x128xf32>
    %cst_5 = arith.constant 9.99999993E-9 : f32
    %13 = vector.broadcast %cst_5 : f32 to vector<4x2x128xf32>
    %14 = arith.maximumf %12, %13 : vector<4x2x128xf32>
    %15 = math.log %14 : vector<4x2x128xf32>
    %c0_6 = arith.constant 0 : index
    %c0_7 = arith.constant 0 : index
    %c0_8 = arith.constant 0 : index
    %c0_9 = arith.constant 0 : index
    %16 = vector.load %arg3[%c0_6, %c0_7, %c0_8, %c0_9] : memref<1x4x2x128xf32, #tpu.memory_space<vmem>>, vector<1x4x2x128xf32>
    %17 = vector.shape_cast %16 : vector<1x4x2x128xf32> to vector<4x2x128xf32>
    %18 = vector.shape_cast %15 : vector<4x2x128xf32> to vector<1x4x2x128xf32>
    tpu.vector_store %arg3[%c0_6, %c0_7, %c0_8, %c0_9], %18 {strides = array<i32>} : memref<1x4x2x128xf32, #tpu.memory_space<vmem>>, vector<1x4x2x128xf32>,
    return
  }
  func.func @transform_0(%arg0: i32, %arg1: i32) -> (i32, i32, i32, i32) {
    %c0_i32 = arith.constant 0 : i32
    %c0_i32_0 = arith.constant 0 : i32
    %c0_i32_1 = arith.constant 0 : i32
    return %arg0, %c0_i32, %arg1, %c0_i32_0 : i32, i32, i32, i32
  }
  func.func @transform_1(%arg0: i32, %arg1: i32) -> (i32, i32, i32, i32) {
    %c0_i32 = arith.constant 0 : i32
    %c0_i32_0 = arith.constant 0 : i32
    %c0_i32_1 = arith.constant 0 : i32
    return %arg0, %c0_i32, %arg1, %c0_i32_0 : i32, i32, i32, i32
  }
}

</mosaic_0001>

<bundles_post_ra>
// kernel: tpu_custom_call.1
= control target key start
LH: loop header
LB: loop body
LE: loop exit
PB: predicated region body
PF: predicated region fallthrough
CT: control target
= control target key end

     0   :  { %6 = vsyncpa [#allocation3], 0  ;;  %s658_s0 = inlined_call_operand.hbm [shape: f32[2,4,2,128], index: 0, kind: input, shape index: {}]   ;;  %s659_s1 = inlined_call_operand.hbm [shape: f32[2,4,2,128], index: 1, kind: output, shape index: {}]  }
   0x1   :  { %8 = vsyncpa [#allocation3 + $0x1], 0 }
   0x2   :  { %9 = vsyncpa [#allocation4], 0 }
   0x3   :  { %11 = vsyncpa [#allocation4 + $0x1], 0  ;;  %s508_s6 = smov 0   ;;  %s510_s7 = smov 0  }
   0x4   :  { %s512_s8 = smov 0   ;;  %s514_s9 = smov 0  }
   0x5   :  { %s516_s10 = smov 0   ;;  %s518_s11 = smov 0  }
   0x6 LB: > { %s289_s12 = sadd.s32 4294967295, %s490_s11   ;;  %s290_s13 = sadd.s32 4294967294, %s490_s11   ;;  %s490_s11 = sphi %s518_s11, %s17_s11   ;;  %s486_s10 = sphi %s516_s10, %s670_s10   ;;  %s482_s9 = sphi %s514_s9, %s669_s9   ;;  %s478_s8 = sphi %s512_s8, %s668_s8   ;;  %s474_s7 = sphi %s510_s7, %s667_s7   ;;  %s470_s6 = sphi %s508_s6, %s666_s6  }
   0x7   : > { %s29_s14 = sadd.s32 1, %s486_s10  ;;  %s38_s15 = sadd.s32 1, %s478_s8 }
   0x8   : > { %p31_p0 = scmp.ge.s32.totalorder %s29_s14, 2  ;;  %p45_p1 = scmp.ne.s32.totalorder %s478_s8, %s474_s7 }
   0x9   : > { %p46_p2 = scmp.eq.s32.totalorder %s490_s11, 0  ;;  %p51_p3 = scmp.ne.s32.totalorder %s474_s7, %s470_s6 }
   0xa   : > { %s672_s14 = smov (%p31_p0, %s29_s14), 0  ;;  %p52_p5 = scmp.eq.s32.totalorder %s289_s12, 0 }
   0xb   : > { %p549_p4 = por %p46_p2, %p45_p1  ;;  %s33_s17 = ssub.s32 %s486_s10, %s672_s14 }
   0xc   : > { %p77_p6 = scmp.eq.s32.totalorder %s289_s12, 1  ;;  %p36_p7 = scmp.eq.s32.totalorder %s33_s17, 0 }
   0xd   : > { %p555_p8 = por %p52_p5, %p51_p3  ;;  %p83_p10 = scmp.eq.s32.totalorder %s290_s13, 1 }
   0xe   : > { %p559_p9 = por %p77_p6, %p45_p1  ;;  %p318_p13 = scmp.lt.s32.totalorder %s490_s11, 2 }
   0xf   : > { %s564_s20 = scalar_select %p36_p7, %s478_s8, %s38_s15  }
  0x10   : > { %p566_p11 = por %p83_p10, %p51_p3  ;;  %s103_s22 = sand.u32 1, %s478_s8  }
  0x11   : > { %s293_s23 = sshll.u32 %s103_s22, 3  ;;  %s304_s24 = sshll.u32 %s486_s10, 7 }
  0x12   : > { %s114_s27 = scalar_lea.hbm %s658_s0, %s304_s24  ;;  %s107_s28 = scalar_lea.vmem [#allocation2], %s293_s23 }
  0x13   : > { %s115_s29 = sshll.u32 %s107_s28, 4  ;;  %p579_p0 = pnand %p318_p13, %p549_p4  ;;  %s116_s29 = int_to_ptr.vmem [resolvable:$true] %s115_s29 }
  0x14   : > { %p296_p1 = scmp.ge.s32.totalorder %s490_s11, 1  ;;  %s104_s2 = scalar_lea.sflag [#allocation3], %s103_s22 }
  0x15   : > { %p384_p2 = pneg %p579_p0  ;;  %s395_s3 = scalar_lea.vmem %s116_s29, 128 }
  0x16   : > { %p396_p3 = scmp.ne.s32.totalorder %s116_s29, %s395_s3  ;;  %s492_s4 = smov [#allocation2]  }
  0x17   : > { %s400_s5 = sshll.u32 %s492_s4, 4  ;;  %s401_s5 = int_to_ptr.vmem [resolvable:$false] %s400_s5 }
  0x18   : > { %p398_p5 = pnand %p396_p3, %p384_p2  ;;  %s402_s12 = scalar_lea.vmem %s401_s5, 256 }
  0x19   : > { %p403_p7 = scmp.lt.s32.totalorder %s116_s29, %s401_s5  ;;  %p404_p10 = scmp.lt.s32.totalorder %s402_s12, %s395_s3 }
  0x1a   : > { %p399_p6 = pneg %p398_p5 }
  0x1b   : > { %p405_p12 = por %p404_p10, %p403_p7 }
  0x1d   : > { %p406_p4 = pnand %p405_p12, %p399_p6 }
  0x1f   : > { %409 = shalt.err (!%p406_p4)
}
  0x20   : > { %s493_s13 = smov 32   ;;  %s494_s15 = smov 2  }
  0x21   : > { %313 = dma.hbm_to_vmem [thread:$0]  (!%p579_p0), %s114_s27, 128, %s116_s29, %s104_s2, %s493_s13, %s493_s13, %s494_s15  }
  0x22   : > { %p123_p13 = scmp.lt.s32.totalorder %s490_s11, 3 }
  0x24   : > { %p124_p2 = pnand %p296_p1, %p123_p13 }
  0x25   : > { %s592_s16 = sand.u32 (!%p124_p2), 1, %s474_s7  }
  0x26   : > { %127 = sbr.rel (%p124_p2) target bundleno = 111 (0x6f), region = 24  ;;  %s297_s17 = sshll.u32 (!%p124_p2), %s592_s16, 3 }
  0x27   : > { %s130_s22 = scalar_lea.sflag (!%p124_p2), [#allocation3], %s592_s16  ;;  %s133_s23 = scalar_lea.vmem (!%p124_p2), [#allocation2], %s297_s17 }
  0x2b   : > { %461 = dma.done.wait (%p555_p8), %s130_s22, 128  }
  0x2c   : > { %463 = vsyncadd (%p555_p8), %s130_s22, 4294967168  ;;  %vm156_vm0 = vcmask 1041408   ;;  %v152_v0 = vld [vmem:[%s133_s23] sm:$0x3]  ;;  %v153_v1 = vld [vmem:[%s133_s23 + $0x2] sm:$0x3] }
  0x2d   : > { %v154_v2 = vld [vmem:[%s133_s23 + $0x4] sm:$0x3]  ;;  %v155_v3 = vld [vmem:[%s133_s23 + $0x6] sm:$0x3]  ;;  %v157_v4 = vsel %vm156_vm0, %v152_v0, 0.0  ;;  %v158_v5 = vsel %vm156_vm0, %v153_v1, 0.0 }
  0x2e   : > { %v160_v6 = vsel %vm156_vm0, %v154_v2, 0.0  ;;  %v159_v7 = vadd.f32 %v158_v5, %v157_v4  ;;  %v162_v8 = vsel %vm156_vm0, %v155_v3, 0.0  ;;  %s151_s18 = scalar_lea.vmem [#allocation5], %s297_s17  ;;  %s305_s25 = sshll.u32 %s482_s9, 7 }
  0x2f   : > { %s204_s24 = sshll.u32 %s151_s18, 4  ;;  %s610_s28 = scalar_lea.hbm %s659_s1, %s305_s25  ;;  %s605_s24 = int_to_ptr.vmem [resolvable:$true] %s204_s24 }
  0x30   : > { %v161_v9 = vadd.f32 %v160_v6, %v159_v7  ;;  %s190_s9 = scalar_lea.sflag [#allocation4], %s592_s16  ;;  %s410_s29 = scalar_lea.vmem %s605_s24, 128 }
  0x31   : > { %p411_p8 = scmp.ne.s32.totalorder %s605_s24, %s410_s29  ;;  %s495_s30 = smov [#allocation5]  }
  0x32   : > { %v163_v10 = vadd.f32 %v162_v8, %v161_v9  ;;  %s414_s2 = sshll.u32 %s495_s30, 4  ;;  %s415_s2 = int_to_ptr.vmem [resolvable:$false] %s414_s2 }
  0x33   : > { %p412_p12 = pnand %p411_p8, %p559_p9  ;;  %s416_s3 = scalar_lea.vmem %s415_s2, 256 }
  0x34   : > { %v164_v11 = vadd.f32 4e-08, %v163_v10  ;;  %p417_p1 = scmp.lt.s32.totalorder %s605_s24, %s415_s2  ;;  %p418_p3 = scmp.lt.s32.totalorder %s416_s3, %s410_s29 }
  0x35   : > { %p413_p0 = pneg %p412_p12 }
  0x36   : > { %372 = vrcp.f32 %v164_v11  ;;  %p419_p5 = por %p418_p3, %p417_p1 }
  0x38   : > { %p420_p6 = pnand %p419_p5, %p413_p0 }
  0x43   : > { %v373_v12 = vpop.eup %372 }
  0x44   : > { %v166_v13 = vmul.f32 %v373_v12, %v164_v11 }
  0x46   : > { %v167_v14 = vsub.f32 2.0, %v166_v13 }
  0x48   : > { %v168_v15 = vmul.f32 %v373_v12, %v167_v14 }
  0x4a   : > { %v169_v16 = vmul.f32 %v168_v15, %v152_v0  ;;  %v170_v17 = vmul.f32 %v168_v15, %v153_v1  ;;  %v171_v18 = vmul.f32 %v168_v15, %v154_v2  ;;  %v172_v19 = vmul.f32 %v168_v15, %v155_v3 }
  0x4c   : > { %v173_v20 = vmax.f32 %v169_v16, 1e-08  ;;  %v174_v21 = vmax.f32 %v170_v17, 1e-08  ;;  %v175_v22 = vmax.f32 %v171_v18, 1e-08 }
  0x4d   : > { %v176_v23 = vmax.f32 %v172_v19, 1e-08 }
  0x4e   : > { %374 = vlog2.f32 %v173_v20 }
  0x4f   : > { %376 = vlog2.f32 %v174_v21 }
  0x50   : > { %378 = vlog2.f32 %v175_v22 }
  0x51   : > { %380 = vlog2.f32 %v176_v23 }
  0x5b   : > { %v375_v24 = vpop.eup %374 }
  0x5c   : > { %v377_v25 = vpop.eup %376  ;;  %v178_v26 = vmul.f32 0.6931472, %v375_v24 }
  0x5d   : > { %v379_v27 = vpop.eup %378  ;;  %v180_v28 = vmul.f32 0.6931472, %v377_v25 }
  0x5e   : > { %v381_v29 = vpop.eup %380  ;;  %185 = vst [vmem:[%s151_s18] sm:$0x3] %v178_v26  ;;  %v182_v30 = vmul.f32 0.6931472, %v379_v27 }
  0x5f   : > { %186 = vst [vmem:[%s151_s18 + $0x2] sm:$0x3] %v180_v28  ;;  %v184_v31 = vmul.f32 0.6931472, %v381_v29 }
  0x60   : > { %187 = vst [vmem:[%s151_s18 + $0x4] sm:$0x3] %v182_v30 }
  0x61   : > { %188 = vst [vmem:[%s151_s18 + $0x6] sm:$0x3] %v184_v31 }
  0x62   : > { %423 = shalt.err (!%p420_p6)
}
  0x63   : > { %s424_s4 = scalar_lea.hbm %s610_s28, 128  ;;  %s428_s13 = scalar_lea.hbm %s659_s1, 256 }
  0x64   : > { %p425_p7 = scmp.ne.s32.totalorder %s610_s28, %s424_s4  ;;  %p429_p13 = scmp.lt.s32.totalorder %s610_s28, %s659_s1 }
  0x65   : > { %p430_p2 = scmp.lt.s32.totalorder %s428_s13, %s424_s4 }
  0x66   : > { %p426_p10 = pnand %p425_p7, %p559_p9 }
  0x67   : > { %p431_p8 = por %p430_p2, %p429_p13 }
  0x68   : > { %p427_p4 = pneg %p426_p10 }
  0x6a   : > { %p432_p12 = pnand %p431_p8, %p427_p4 }
  0x6c   : > { %435 = shalt.err (!%p432_p12)
}
  0x6d   : > { %s496_s22 = smov 32   ;;  %s497_s23 = smov 2  }
  0x6e   : > { %308 = dma.vmem_to_hbm [thread:$0]  (%p559_p9), %s605_s24, 128, %s610_s28, %s190_s9, %s496_s22, %s496_s22, %s497_s23  }
  0x6f PF: > { %s219_s18 = sand.u32 1, %s470_s6   ;;  %p665_p0 = scmp.ge.s32.totalorder %s490_s11, 2 }
  0x70   : > { %s220_s25 = scalar_lea.sflag [#allocation4], %s219_s18 }
  0x71   : > { %p315_p1 = pnand %p665_p0, %p566_p11 }
  0x73   : > { %p316_p3 = pneg %p315_p1 }
  0x75   : > { %465 = dma.done.wait (%p316_p3), %s220_s25, 128  }
  0x76   : > { %467 = vsyncadd (%p316_p3), %s220_s25, 4294967168  ;;  %s17_s11 = sadd.s32 1, %s490_s11   ;;  %s666_s6 = smov %s474_s7 }
  0x77   : > { %p14_p5 = scmp.ge.s32.totalorder %s17_s11, 4   ;;  %s667_s7 = smov %s478_s8 }
  0x78   : > { %s668_s8 = smov %s564_s20  ;;  %s669_s9 = smov %s486_s10 }
  0x79   : > { %s670_s10 = smov %s672_s14  ;;  %16 = sbr.rel (!%p14_p5) target bundleno = 6 (0x6), region = 69 }
  0x7e   :  { %225 = vsyncpa [#allocation3], 1 }
  0x7f   :  { %227 = vsyncpa [#allocation3 + $0x1], 1 }
  0x80   :  { %228 = vsyncpa [#allocation4], 1 }
  0x81   :  { %230 = vsyncpa [#allocation4 + $0x1], 1 }

</bundles_post_ra>
